<compile_context>
chip_gen: v6e
topology: v6e:2x2x1
jax: 0.10.0
libtpu: 0.0.40
codegen_flags: <defaults>
</compile_context>

<pallas_src>
import jax
import jax.numpy as jnp
from jax.experimental import pallas as pl
from jax.experimental.pallas import tpu as pltpu

# Batch-tile size. Multiple of 8 (f32 sublane). Sized so double-buffered
# activation tiles + the (TM,128) f32 output slab stay far under the 32 MiB
# default scoped-VMEM limit even on v7x (64 MiB physical).
BLOCK_B = 512


def _round_up(x, m):
    return (x + m - 1) // m * m


def critic_kernel(s_ref, a_ref, ws_ref, wa_ref, bsa_ref, w7_ref, b7_ref, out_ref):
    # Folded state / action branches: bf16 operands on the MXU, f32 accumulation.
    x = jnp.dot(s_ref[...], ws_ref[...], preferred_element_type=jnp.float32)
    y = jnp.dot(a_ref[...], wa_ref[...], preferred_element_type=jnp.float32)

    # relu(fc3(state branch) + fc6(action branch)) with both folded biases
    # pre-fused into a single (1, 64) row.
    h = jnp.maximum(x + y + bsa_ref[...], 0.0)                 # (TM, 64) f32

    # fc7 (N=1): VPU multiply + cross-lane reduce instead of a narrow MXU matmul.
    q = jnp.sum(h * w7_ref[...], axis=-1, keepdims=True) + b7_ref[...]   # (TM, 1)

    # Lane-dense store: broadcast q across the 128-wide padded output slab.
    out_ref[...] = jnp.broadcast_to(q, out_ref.shape).astype(out_ref.dtype)


def init_params(key, state_dim, action_dim):
    """Synthetic init mirroring the PyTorch __init__ shapes.

    Weights ~ N(0, 0.1); biases ~ N(0.1, 1.0). Weights stored transposed as
    (in_dim, out_dim) so each layer is `x @ W + b`.
    """
    dims = [
        (state_dim, 256),   # fc1
        (256, 128),         # fc2
        (128, 64),          # fc3
        (action_dim, 256),  # fc4
        (256, 128),         # fc5
        (128, 64),          # fc6
        (64, 1),            # fc7
    ]
    params = []
    for (din, dout) in dims:
        key, kw, kb = jax.random.split(key, 3)
        w = 0.1 * jax.random.normal(kw, (din, dout), dtype=jnp.float32)
        b = 0.1 + 1.0 * jax.random.normal(kb, (1, dout), dtype=jnp.float32)
        params.append((w, b))
    return params


def fold_params(params):
    """Collapse the purely-linear fc1-3 / fc4-6 chains. Done once, in f32."""
    (w1, b1), (w2, b2), (w3, b3), (w4, b4), (w5, b5), (w6, b6), (w7, b7) = params
    ws = w1 @ w2 @ w3                              # (state_dim, 64)
    bs = b1 @ w2 @ w3 + b2 @ w3 + b3               # (1, 64)
    wa = w4 @ w5 @ w6                              # (action_dim, 64)
    ba = b4 @ w5 @ w6 + b5 @ w6 + b6               # (1, 64)
    return (
        ws.astype(jnp.bfloat16),                   # MXU operand
        wa.astype(jnp.bfloat16),                   # MXU operand
        (bs + ba).astype(jnp.float32),             # fused bias row, (1, 64)
        jnp.reshape(w7, (1, -1)).astype(jnp.float32),   # fc7 weight as a lane row
        b7.astype(jnp.float32),                    # (1, 1)
    )


@jax.jit
def critic_forward(s, a, folded):
    ws, wa, bsa, w7r, b7 = folded
    batch, state_dim = s.shape
    action_dim = a.shape[1]

    tm = min(BLOCK_B, _round_up(batch, 8))
    b_pad = _round_up(batch, tm)

    # bf16 activations halve HBM->VMEM traffic; MXU accumulates in f32.
    s_p = s.astype(jnp.bfloat16)
    a_p = a.astype(jnp.bfloat16)
    if b_pad != batch:
        s_p = jnp.pad(s_p, ((0, b_pad - batch), (0, 0)))
        a_p = jnp.pad(a_p, ((0, b_pad - batch), (0, 0)))

    flops = 2 * b_pad * 64 * (state_dim + action_dim) + 6 * b_pad * 64
    bytes_accessed = (s_p.size * 2 + a_p.size * 2 + b_pad * 128 * 4
                      + ws.size * 2 + wa.size * 2
                      + (bsa.size + w7r.size + b7.size) * 4)

    out = pl.pallas_call(
        critic_kernel,
        out_shape=jax.ShapeDtypeStruct((b_pad, 128), jnp.float32),
        grid=(b_pad // tm,),
        in_specs=[
            # activations: tiled over the batch axis
            pl.BlockSpec((tm, state_dim), lambda i: (i, 0)),
            pl.BlockSpec((tm, action_dim), lambda i: (i, 0)),
            # weights / biases: same block every grid step -> VMEM-resident
            pl.BlockSpec((state_dim, 64), lambda i: (0, 0)),
            pl.BlockSpec((action_dim, 64), lambda i: (0, 0)),
            pl.BlockSpec((1, 64), lambda i: (0, 0)),
            pl.BlockSpec((1, 64), lambda i: (0, 0)),
            pl.BlockSpec((1, 1), lambda i: (0, 0)),
        ],
        out_specs=pl.BlockSpec((tm, 128), lambda i: (i, 0)),
        compiler_params=pltpu.CompilerParams(
            dimension_semantics=("parallel",)),
        cost_estimate=pl.CostEstimate(
            flops=flops, transcendentals=0, bytes_accessed=bytes_accessed),
    )(s_p, a_p, ws, wa, bsa, w7r, b7)

    # lane 0 of the padded slab holds q; drop batch padding.
    return out[:batch, :1]


def critic_reference(s, a, params):
    """Unfused f32 reference matching the PyTorch module exactly."""
    (w1, b1), (w2, b2), (w3, b3), (w4, b4), (w5, b5), (w6, b6), (w7, b7) = params
    x = s @ w1 + b1
    x = x @ w2 + b2
    x = x @ w3 + b3
    y = a @ w4 + b4
    y = y @ w5 + b5
    y = y @ w6 + b6
    h = jnp.maximum(x + y, 0.0)
    return h @ w7 + b7


def critic_reference_folded(s, a, folded):
    """Reference implementing the same folded / bf16-MXU math as the kernel."""
    ws, wa, bsa, w7r, b7 = folded
    x = jnp.dot(s.astype(jnp.bfloat16), ws, preferred_element_type=jnp.float32)
    y = jnp.dot(a.astype(jnp.bfloat16), wa, preferred_element_type=jnp.float32)
    h = jnp.maximum(x + y + bsa, 0.0)
    return jnp.sum(h * w7r, axis=-1, keepdims=True) + b7


if __name__ == "__main__":
    key = jax.random.PRNGKey(0)
    batch, state_dim, action_dim = 2, 16, 8

    k_params, k_s, k_a = jax.random.split(key, 3)
    params = init_params(k_params, state_dim, action_dim)
    folded = fold_params(params)

    s = jax.random.normal(k_s, (batch, state_dim), dtype=jnp.float32)
    a = jax.random.normal(k_a, (batch, action_dim), dtype=jnp.float32)

    out = critic_forward(s, a, folded)
    out = jax.block_until_ready(out)
    assert out.shape == (batch, 1)

    # Tight check vs. a reference doing the same folded/bf16-operand math.
    ref_same = critic_reference_folded(s, a, folded)
    assert jnp.allclose(out, ref_same, atol=1e-4, rtol=1e-4), (out, ref_same)

    # Looser check vs. the exact PyTorch-semantics f32 path: bf16 MXU operands
    # (f32 accumulation) introduce ~1e-2-scale differences at these magnitudes.
    ref_f32 = critic_reference(s, a, params)
    assert jnp.allclose(out, ref_f32, atol=5e-2, rtol=5e-2), (out, ref_f32)

    print("KERNEL_OK")
</pallas_src>

<mosaic_0001>
module attributes {stable_mosaic.version = 11 : i64} {
  func.func @critic_kernel(%arg0: i32, %arg1: memref<8x16xbf16, #tpu.memory_space<vmem>>, %arg2: memref<8x8xbf16, #tpu.memory_space<vmem>>, %arg3: memref<16x64xbf16, #tpu.memory_space<vmem>>, %arg4: memref<8x64xbf16, #tpu.memory_space<vmem>>, %arg5: memref<1x64xf32, #tpu.memory_space<vmem>>, %arg6: memref<1x64xf32, #tpu.memory_space<vmem>>, %arg7: memref<1x1xf32, #tpu.memory_space<vmem>>, %arg8: memref<8x128xf32, #tpu.memory_space<vmem>>) attributes {dimension_semantics = [#tpu.dimension_semantics<parallel>], iteration_bounds = array<i64: 1>, scalar_prefetch = 0 : i64, scratch_operands = 0 : i64, tpu.core_type = #tpu.core_type<tc>, window_params = [{transform_indices = @transform_0, window_bounds = array<i64: 8, 16>}, {transform_indices = @transform_1, window_bounds = array<i64: 8, 8>}, {pipeline_mode = #tpu.pipeline_mode<synchronous>, transform_indices = @transform_2, window_bounds = array<i64: 16, 64>}, {pipeline_mode = #tpu.pipeline_mode<synchronous>, transform_indices = @transform_3, window_bounds = array<i64: 8, 64>}, {pipeline_mode = #tpu.pipeline_mode<synchronous>, transform_indices = @transform_4, window_bounds = array<i64: 1, 64>}, {pipeline_mode = #tpu.pipeline_mode<synchronous>, transform_indices = @transform_5, window_bounds = array<i64: 1, 64>}, {pipeline_mode = #tpu.pipeline_mode<synchronous>, transform_indices = @transform_6, window_bounds = array<i64: 1, 1>}, {transform_indices = @transform_7, window_bounds = array<i64: 8, 128>}]} {
    %c0 = arith.constant 0 : index
    %c0_0 = arith.constant 0 : index
    %0 = vector.load %arg1[%c0, %c0_0] : memref<8x16xbf16, #tpu.memory_space<vmem>>, vector<8x16xbf16>
    %c0_1 = arith.constant 0 : index
    %c0_2 = arith.constant 0 : index
    %1 = vector.load %arg3[%c0_1, %c0_2] : memref<16x64xbf16, #tpu.memory_space<vmem>>, vector<16x64xbf16>
    %cst = arith.constant dense<0.000000e+00> : vector<8x64xf32>
    %2 = tpu.matmul %0, %1, %cst {dimension_numbers = #tpu.dot_dimension_numbers<[1], [0], [0], [1], [0, 0, 1, 1], [], []>} : vector<8x16xbf16>, vector<16x64xbf16>, vector<8x64xf32> -> vector<8x64xf32>
    %c0_3 = arith.constant 0 : index
    %c0_4 = arith.constant 0 : index
    %3 = vector.load %arg2[%c0_3, %c0_4] : memref<8x8xbf16, #tpu.memory_space<vmem>>, vector<8x8xbf16>
    %c0_5 = arith.constant 0 : index
    %c0_6 = arith.constant 0 : index
    %4 = vector.load %arg4[%c0_5, %c0_6] : memref<8x64xbf16, #tpu.memory_space<vmem>>, vector<8x64xbf16>
    %cst_7 = arith.constant dense<0.000000e+00> : vector<8x64xf32>
    %5 = tpu.matmul %3, %4, %cst_7 {dimension_numbers = #tpu.dot_dimension_numbers<[1], [0], [0], [1], [0, 0, 1, 1], [], []>} : vector<8x8xbf16>, vector<8x64xbf16>, vector<8x64xf32> -> vector<8x64xf32>
    %6 = arith.addf %2, %5 : vector<8x64xf32>
    %c0_8 = arith.constant 0 : index
    %c0_9 = arith.constant 0 : index
    %7 = vector.load %arg5[%c0_8, %c0_9] : memref<1x64xf32, #tpu.memory_space<vmem>>, vector<1x64xf32>
    %8 = vector.broadcast %7 : vector<1x64xf32> to vector<8x64xf32>
    %9 = arith.addf %6, %8 : vector<8x64xf32>
    %cst_10 = arith.constant 0.000000e+00 : f32
    %10 = vector.broadcast %cst_10 : f32 to vector<8x64xf32>
    %11 = arith.maximumf %9, %10 : vector<8x64xf32>
    %c0_11 = arith.constant 0 : index
    %c0_12 = arith.constant 0 : index
    %12 = vector.load %arg6[%c0_11, %c0_12] : memref<1x64xf32, #tpu.memory_space<vmem>>, vector<1x64xf32>
    %13 = vector.broadcast %12 : vector<1x64xf32> to vector<8x64xf32>
    %14 = arith.mulf %11, %13 : vector<8x64xf32>
    %cst_13 = arith.constant dense<0.000000e+00> : vector<8xf32>
    %15 = vector.multi_reduction <add>, %14, %cst_13 [1] : vector<8x64xf32> to vector<8xf32>
    %16 = vector.shape_cast %15 : vector<8xf32> to vector<8x1xf32>
    %c0_14 = arith.constant 0 : index
    %c0_15 = arith.constant 0 : index
    %17 = vector.load %arg7[%c0_14, %c0_15] : memref<1x1xf32, #tpu.memory_space<vmem>>, vector<1x1xf32>
    %18 = vector.broadcast %17 : vector<1x1xf32> to vector<8x1xf32>
    %19 = arith.addf %16, %18 : vector<8x1xf32>
    %20 = vector.shape_cast %19 : vector<8x1xf32> to vector<8x1xf32>
    %21 = vector.broadcast %20 : vector<8x1xf32> to vector<8x128xf32>
    %c0_16 = arith.constant 0 : index
    %c0_17 = arith.constant 0 : index
    %22 = vector.load %arg8[%c0_16, %c0_17] : memref<8x128xf32, #tpu.memory_space<vmem>>, vector<8x128xf32>
    tpu.vector_store %arg8[%c0_16, %c0_17], %21 {strides = array<i32>} : memref<8x128xf32, #tpu.memory_space<vmem>>, vector<8x128xf32>,
    return
  }
  func.func @transform_0(%arg0: i32) -> (i32, i32) {
    %c0_i32 = arith.constant 0 : i32
    %c0_i32_0 = arith.constant 0 : i32
    return %arg0, %c0_i32 : i32, i32
  }
  func.func @transform_1(%arg0: i32) -> (i32, i32) {
    %c0_i32 = arith.constant 0 : i32
    %c0_i32_0 = arith.constant 0 : i32
    return %arg0, %c0_i32 : i32, i32
  }
  func.func @transform_2(%arg0: i32) -> (i32, i32) {
    %c0_i32 = arith.constant 0 : i32
    %c0_i32_0 = arith.constant 0 : i32
    %c0_i32_1 = arith.constant 0 : i32
    return %c0_i32, %c0_i32_0 : i32, i32
  }
  func.func @transform_3(%arg0: i32) -> (i32, i32) {
    %c0_i32 = arith.constant 0 : i32
    %c0_i32_0 = arith.constant 0 : i32
    %c0_i32_1 = arith.constant 0 : i32
    return %c0_i32, %c0_i32_0 : i32, i32
  }
  func.func @transform_4(%arg0: i32) -> (i32, i32) {
    %c0_i32 = arith.constant 0 : i32
    %c0_i32_0 = arith.constant 0 : i32
    %c0_i32_1 = arith.constant 0 : i32
    return %c0_i32, %c0_i32_0 : i32, i32
  }
  func.func @transform_5(%arg0: i32) -> (i32, i32) {
    %c0_i32 = arith.constant 0 : i32
    %c0_i32_0 = arith.constant 0 : i32
    %c0_i32_1 = arith.constant 0 : i32
    return %c0_i32, %c0_i32_0 : i32, i32
  }
  func.func @transform_6(%arg0: i32) -> (i32, i32) {
    %c0_i32 = arith.constant 0 : i32
    %c0_i32_0 = arith.constant 0 : i32
    %c0_i32_1 = arith.constant 0 : i32
    return %c0_i32, %c0_i32_0 : i32, i32
  }
  func.func @transform_7(%arg0: i32) -> (i32, i32) {
    %c0_i32 = arith.constant 0 : i32
    %c0_i32_0 = arith.constant 0 : i32
    return %arg0, %c0_i32 : i32, i32
  }
}

</mosaic_0001>

<bundles_post_ra>
// kernel: critic_forward.1
= control target key start
LH: loop header
LB: loop body
LE: loop exit
PB: predicated region body
PF: predicated region fallthrough
CT: control target
= control target key end

     0   :  { %vm38_vm0 = vcmask 1043456   ;;  %v198_v0 = vmov 0.0   ;;  %vm199_vm1 = vmmov 0   ;;  %vm34_vm2 = vcmask 64512   ;;  %s265_s3 = inlined_call_operand.vmem [shape: bf16[8,64], index: 3, kind: input, shape index: {}]   ;;  %s266_s2 = inlined_call_operand.vmem [shape: bf16[16,64], index: 2, kind: input, shape index: {}]   ;;  %s267_s1 = inlined_call_operand.vmem [shape: bf16[8,8], index: 1, kind: input, shape index: {}]   ;;  %s268_s0 = inlined_call_operand.vmem [shape: bf16[8,16], index: 0, kind: input, shape index: {}]   ;;  %s269_s6 = inlined_call_operand.<no memory space> [shape: f32[1,1], index: 6, kind: input, shape index: {}]   ;;  %s270_s4 = inlined_call_operand.vmem [shape: f32[1,64], index: 4, kind: input, shape index: {}]   ;;  %s271_s5 = inlined_call_operand.vmem [shape: f32[1,64], index: 5, kind: input, shape index: {}]   ;;  %s272_s7 = inlined_call_operand.vmem [shape: f32[8,128], index: 7, kind: output, shape index: {}]  }
   0x1   :  { %181 = vmatprep.subr.bf16.mxu0 %v198_v0  ;;  %v33_v1 = vld [vmem:[%s265_s3] sm:$0xf]  ;;  %187 = vmatprep.subr.bf16.mxu1 %v198_v0  ;;  %vm88_vm3 = vcmask 130048   ;;  %v12_v6 = vstv %s269_s6  ;;  %vm149_vm4 = vcmask 523264   ;;  %v200_v22 = vmov 0  }
   0x2   :  { %v40_v2 = vsel %vm38_vm0, %v33_v1, 0  ;;  %v197_v3 = vld [vmem:[%s266_s2] sm:$0xff]   ;;  %183 = vmatprep.mubr.msk.bf16.mxu0 %vm199_vm1, %v198_v0  ;;  %189 = vmatprep.mubr.msk.bf16.mxu1 %vm199_vm1, %v198_v0  ;;  %13 = vst [vmem:[#allocation2] sm:$0x1] %v12_v6 }
   0x3   :  { %182 = vmatpush3.bf16.msra.mxu0 %v40_v2  ;;  %v32_v4 = vld [vmem:[%s267_s1] sm:$0xf]  ;;  %188 = vmatpush3.bf16.msra.mxu1 %v197_v3 }
   0x4   :  { %v29_v5 = vld [vmem:[%s268_s0] sm:$0xf]  ;;  %196 = vset.pattern.permute.xlu0 %v200_v22 }
   0x5   :  { %v174_v9 = vld [vmem:[%s270_s4] ss:$0 sm:$0xff] }
   0x6   :  { %184 = vmatmul.mubr.msk.bf16.vlgmr.msra.gmra.mxu0 %vm34_vm2, %v32_v4  ;;  %190 = vmatmul.mubr.msk.bf16.vlgmr.msra.gmra.mxu1 %vm88_vm3, %v29_v5  ;;  %v175_v16 = vld [vmem:[%s271_s5] ss:$0 sm:$0xff] }
   0x9   :  { %v176_v23 = vld [vmem:[#allocation2] ss:$0 sm:$0xff] }
  0xc6   :  { %v76_v7 = vpop.f32.mrf.mxu0  ;;  %v126_v8 = vpop.f32.mrf.mxu1 }
  0xc7   :  { %v127_v10 = vadd.f32 %v126_v8, %v76_v7 }
  0xc8   :  { %v185_v11 = vpop.f32.mrf.mxu0  ;;  %v191_v12 = vpop.f32.mrf.mxu1 }
  0xc9   :  { %v139_v13 = vadd.f32 %v174_v9, %v127_v10 }
  0xca   :  { %v79_v14 = vpop.f32.mrf.mxu0  ;;  %v129_v15 = vpop.f32.mrf.mxu1 }
  0xcb   :  { %v140_v17 = vmax.f32 %v139_v13, 0.0 }
  0xcc   :  { %v186_v18 = vpop.f32.mrf.mxu0  ;;  %v192_v19 = vpop.f32.mrf.mxu1 }
  0xcd   :  { %v148_v20 = vmul.f32 %v175_v16, %v140_v17 }
  0xcf   :  { %v150_v21 = vsel %vm149_vm4, %v148_v20, 0.0 }
  0xd0   :  { %151 = vadd.xlane.f32.xlu0 %v150_v21 }
 0x159   :  { %v152_v24 = vpop.xlane.xlu0 %151 }
 0x15a   :  { %v160_v25 = vadd.f32 %v176_v23, %v152_v24 }
 0x15c   :  { %163 = vperm.xlu0 %196, %v160_v25  }
 0x1d7   :  { %v164_v26 = vpop.permute.xlu0 %163 }
 0x1d8   :  { %166 = vst [vmem:[%s272_s7] sm:$0xff] %v164_v26 }

</bundles_post_ra>
